<compile_context>
chip_gen: v7x
topology: tpu7x:2x2x1
jax: 0.10.0
libtpu: 0.0.40
codegen_flags: <defaults>
</compile_context>

<pallas_src>
import jax
import jax.numpy as jnp
from jax.experimental import pallas as pl
from jax.experimental.pallas import tpu as pltpu


def _round_up(x, m):
    return (x + m - 1) // m * m


def conv_bn_relu_kernel(xp_ref, w_ref, scale_ref, bias_ref, o_ref):
    # xp_ref:    (TM, Kp)  bf16   im2col patch rows (K = 9*Cin, zero-padded to 128-mult)
    # w_ref:     (Kp, TN)  bf16   conv weights, (ky,kx,cin)-major, Cout tile on lanes
    # scale_ref: (1,  TN)  f32    fused BN scale = gamma / sqrt(var + eps)
    # bias_ref:  (1,  TN)  f32    fused BN bias  = beta + (conv_b - mean) * scale
    # o_ref:     (TM, TN)  f32
    acc = jnp.dot(xp_ref[...], w_ref[...], preferred_element_type=jnp.float32)
    y = acc * scale_ref[...] + bias_ref[...]
    o_ref[...] = jnp.maximum(y, 0.0).astype(o_ref.dtype)


def conv_bn_relu(x_nchw, w_oihw, conv_b, gamma, beta, run_mean, run_var, eps=1e-5):
    N, Cin, H, W = x_nchw.shape
    Cout, _, KH, KW = w_oihw.shape

    # ---- glue: layout conversion + im2col (not the hot path) ----
    # TODO(synk): in a real pipeline keep activations NHWC across layers so the
    # NCHW<->NHWC transposes below disappear.
    x = jnp.transpose(x_nchw, (0, 2, 3, 1))                       # NHWC
    x_pad = jnp.pad(x, ((0, 0), (1, 1), (1, 1), (0, 0)))          # pad=1
    # im2col: concat the KH*KW shifted taps along channels -> (N, H, W, 9*Cin),
    # (ky, kx, cin) ordering with cin fastest.
    taps = [x_pad[:, ky:ky + H, kx:kx + W, :]
            for ky in range(KH) for kx in range(KW)]
    K = KH * KW * Cin
    M = N * H * W
    patches = jnp.concatenate(taps, axis=-1).reshape(M, K)

    # weights: OIHW -> HWIO -> (K = ky*kx*cin, Cout), matching the patch order.
    w = jnp.transpose(w_oihw, (2, 3, 1, 0)).reshape(K, Cout)

    # Fold conv bias + BatchNorm (running stats) into per-channel scale/bias.
    scale = gamma / jnp.sqrt(run_var + eps)
    bias = beta + (conv_b - run_mean) * scale

    # ---- lane-dense padding + tiling ----
    Kp = _round_up(K, 128)                 # contraction dim, 128-aligned lanes
    Coutp = _round_up(Cout, 128)           # output lanes, unmasked stores
    TN = 256 if Coutp % 256 == 0 else 128  # feed the 256-wide MXU when possible
    TM = 256 if M >= 256 else _round_up(M, 8)
    Mp = _round_up(M, TM)

    patches = jnp.pad(patches, ((0, Mp - M), (0, Kp - K))).astype(jnp.bfloat16)
    w = jnp.pad(w, ((0, Kp - K), (0, Coutp - Cout))).astype(jnp.bfloat16)
    scale_p = jnp.pad(scale, (0, Coutp - Cout)).reshape(1, Coutp).astype(jnp.float32)
    bias_p = jnp.pad(bias, (0, Coutp - Cout)).reshape(1, Coutp).astype(jnp.float32)

    grid = (Mp // TM, Coutp // TN)

    out = pl.pallas_call(
        conv_bn_relu_kernel,
        out_shape=jax.ShapeDtypeStruct((Mp, Coutp), jnp.float32),
        grid_spec=pltpu.PrefetchScalarGridSpec(
            num_scalar_prefetch=0,
            grid=grid,
            in_specs=[
                pl.BlockSpec((TM, Kp), lambda i, j: (i, 0)),
                pl.BlockSpec((Kp, TN), lambda i, j: (0, j)),
                pl.BlockSpec((1, TN), lambda i, j: (0, j)),
                pl.BlockSpec((1, TN), lambda i, j: (0, j)),
            ],
            out_specs=pl.BlockSpec((TM, TN), lambda i, j: (i, j)),
        ),
        compiler_params=pltpu.CompilerParams(
            dimension_semantics=("parallel", "parallel"),
            vmem_limit_bytes=32 * 1024 * 1024,
        ),
    )(patches, w, scale_p, bias_p)

    # TODO(synk): Dropout(p=0.1) is identity in eval mode; training-mode RNG
    # dropout (pltpu.prng_seed/prng_random_bits) omitted.
    out = out[:M, :Cout].reshape(N, H, W, Cout)
    return jnp.transpose(out, (0, 3, 1, 2)).astype(x_nchw.dtype)   # back to NCHW


def reference(x_nchw, w_oihw, conv_b, gamma, beta, run_mean, run_var, eps=1e-5):
    y = jax.lax.conv_general_dilated(
        x_nchw, w_oihw, window_strides=(1, 1), padding="SAME",
        dimension_numbers=("NCHW", "OIHW", "NCHW"))
    y = y + conv_b[None, :, None, None]
    y = (y - run_mean[None, :, None, None]) / jnp.sqrt(run_var + eps)[None, :, None, None]
    y = y * gamma[None, :, None, None] + beta[None, :, None, None]
    return jnp.maximum(y, 0.0)


if __name__ == "__main__":
    key = jax.random.PRNGKey(0)
    k_x, k_w, k_b, k_g, k_bt, k_m, k_v = jax.random.split(key, 7)

    N, Cin, Cout, H, W = 2, 4, 8, 16, 16

    x = jax.random.normal(k_x, (N, Cin, H, W), jnp.float32)
    w = jax.random.normal(k_w, (Cout, Cin, 3, 3), jnp.float32) * 0.1
    conv_b = jax.random.normal(k_b, (Cout,), jnp.float32) * 0.1
    gamma = 1.0 + 0.1 * jax.random.normal(k_g, (Cout,), jnp.float32)
    beta = 0.1 * jax.random.normal(k_bt, (Cout,), jnp.float32)
    run_mean = 0.1 * jax.random.normal(k_m, (Cout,), jnp.float32)
    run_var = jnp.abs(1.0 + 0.1 * jax.random.normal(k_v, (Cout,), jnp.float32))

    out = conv_bn_relu(x, w, conv_b, gamma, beta, run_mean, run_var)
    out = jax.block_until_ready(out)

    ref = reference(x, w, conv_b, gamma, beta, run_mean, run_var)
    assert out.shape == (N, Cout, H, W)
    # Tolerance loosened for the bf16 MXU matmul (f32 accumulation).
    max_err = float(jnp.max(jnp.abs(out - ref)))
    assert jnp.allclose(out, ref, atol=5e-2, rtol=5e-2), max_err

    print("KERNEL_OK")
</pallas_src>

<mosaic_0001>
module attributes {stable_mosaic.version = 11 : i64} {
  func.func @conv_bn_relu_kernel(%arg0: i32, %arg1: i32, %arg2: memref<256x128xbf16, #tpu.memory_space<vmem>>, %arg3: memref<128x128xbf16, #tpu.memory_space<vmem>>, %arg4: memref<1x128xf32, #tpu.memory_space<vmem>>, %arg5: memref<1x128xf32, #tpu.memory_space<vmem>>, %arg6: memref<256x128xf32, #tpu.memory_space<vmem>>) attributes {dimension_semantics = [#tpu.dimension_semantics<parallel>, #tpu.dimension_semantics<parallel>], iteration_bounds = array<i64: 2, 1>, scalar_prefetch = 0 : i64, scratch_operands = 0 : i64, tpu.core_type = #tpu.core_type<tc>, window_params = [{transform_indices = @transform_0, window_bounds = array<i64: 256, 128>}, {transform_indices = @transform_1, window_bounds = array<i64: 128, 128>}, {transform_indices = @transform_2, window_bounds = array<i64: 1, 128>}, {transform_indices = @transform_3, window_bounds = array<i64: 1, 128>}, {transform_indices = @transform_4, window_bounds = array<i64: 256, 128>}]} {
    %c0 = arith.constant 0 : index
    %c0_0 = arith.constant 0 : index
    %0 = vector.load %arg2[%c0, %c0_0] : memref<256x128xbf16, #tpu.memory_space<vmem>>, vector<256x128xbf16>
    %c0_1 = arith.constant 0 : index
    %c0_2 = arith.constant 0 : index
    %1 = vector.load %arg3[%c0_1, %c0_2] : memref<128x128xbf16, #tpu.memory_space<vmem>>, vector<128x128xbf16>
    %cst = arith.constant dense<0.000000e+00> : vector<256x128xf32>
    %2 = tpu.matmul %0, %1, %cst {dimension_numbers = #tpu.dot_dimension_numbers<[1], [0], [0], [1], [0, 0, 1, 1], [], []>} : vector<256x128xbf16>, vector<128x128xbf16>, vector<256x128xf32> -> vector<256x128xf32>
    %c0_3 = arith.constant 0 : index
    %c0_4 = arith.constant 0 : index
    %3 = vector.load %arg4[%c0_3, %c0_4] : memref<1x128xf32, #tpu.memory_space<vmem>>, vector<1x128xf32>
    %4 = vector.broadcast %3 : vector<1x128xf32> to vector<256x128xf32>
    %5 = arith.mulf %2, %4 : vector<256x128xf32>
    %c0_5 = arith.constant 0 : index
    %c0_6 = arith.constant 0 : index
    %6 = vector.load %arg5[%c0_5, %c0_6] : memref<1x128xf32, #tpu.memory_space<vmem>>, vector<1x128xf32>
    %7 = vector.broadcast %6 : vector<1x128xf32> to vector<256x128xf32>
    %8 = arith.addf %5, %7 : vector<256x128xf32>
    %cst_7 = arith.constant 0.000000e+00 : f32
    %9 = vector.broadcast %cst_7 : f32 to vector<256x128xf32>
    %10 = arith.maximumf %8, %9 : vector<256x128xf32>
    %c0_8 = arith.constant 0 : index
    %c0_9 = arith.constant 0 : index
    %11 = vector.load %arg6[%c0_8, %c0_9] : memref<256x128xf32, #tpu.memory_space<vmem>>, vector<256x128xf32>
    tpu.vector_store %arg6[%c0_8, %c0_9], %10 {strides = array<i32>} : memref<256x128xf32, #tpu.memory_space<vmem>>, vector<256x128xf32>,
    return
  }
  func.func @transform_0(%arg0: i32, %arg1: i32) -> (i32, i32) {
    %c0_i32 = arith.constant 0 : i32
    %c0_i32_0 = arith.constant 0 : i32
    return %arg0, %c0_i32 : i32, i32
  }
  func.func @transform_1(%arg0: i32, %arg1: i32) -> (i32, i32) {
    %c0_i32 = arith.constant 0 : i32
    %c0_i32_0 = arith.constant 0 : i32
    return %c0_i32, %arg1 : i32, i32
  }
  func.func @transform_2(%arg0: i32, %arg1: i32) -> (i32, i32) {
    %c0_i32 = arith.constant 0 : i32
    %c0_i32_0 = arith.constant 0 : i32
    return %c0_i32, %arg1 : i32, i32
  }
  func.func @transform_3(%arg0: i32, %arg1: i32) -> (i32, i32) {
    %c0_i32 = arith.constant 0 : i32
    %c0_i32_0 = arith.constant 0 : i32
    return %c0_i32, %arg1 : i32, i32
  }
  func.func @transform_4(%arg0: i32, %arg1: i32) -> (i32, i32) {
    %c0_i32 = arith.constant 0 : i32
    return %arg0, %arg1 : i32, i32
  }
}

</mosaic_0001>

<bundles_post_ra>
// kernel: tpu_custom_call.1
= control target key start
LH: loop header
LB: loop body
LE: loop exit
PB: predicated region body
PF: predicated region fallthrough
CT: control target
= control target key end

     0   :  { %9 = vsyncpa [#allocation3], 0  ;;  %s1679_s0 = inlined_call_operand.hbm [shape: bf16[512,128], index: 0, kind: input, shape index: {}]   ;;  %s1680_s1 = inlined_call_operand.hbm [shape: bf16[128,128], index: 1, kind: input, shape index: {}]   ;;  %s1681_s2 = inlined_call_operand.vmem [shape: f32[1,128], index: 2, kind: input, shape index: {}]   ;;  %s1682_s3 = inlined_call_operand.vmem [shape: f32[1,128], index: 3, kind: input, shape index: {}]   ;;  %s1683_s4 = inlined_call_operand.hbm [shape: f32[512,128], index: 4, kind: output, shape index: {}]  }
   0x1   :  { %11 = vsyncpa [#allocation3 + $0x1], 0 }
   0x2   :  { %12 = vsyncpa [#allocation6], 0 }
   0x3   :  { %13 = vsyncpa [#allocation4], 0 }
   0x4   :  { %15 = vsyncpa [#allocation4 + $0x1], 0  ;;  %s1326_s15 = smov 0   ;;  %s1328_s16 = smov 0  }
   0x5   :  { %s1330_s17 = smov 0   ;;  %s1332_s18 = smov 0  }
   0x6   :  { %s1334_s19 = smov 0   ;;  %s1336_s20 = smov 0  }
   0x7 LB: > { %s912_s21 = sadd.s32 4294967295, %s1292_s20   ;;  %s913_s22 = sadd.s32 4294967294, %s1292_s20   ;;  %s1292_s20 = sphi %s1336_s20, %s21_s20   ;;  %s1288_s19 = sphi %s1334_s19, %s1707_s19   ;;  %s1284_s18 = sphi %s1332_s18, %s1706_s18   ;;  %s1280_s17 = sphi %s1330_s17, %s1705_s17   ;;  %s1276_s16 = sphi %s1328_s16, %s1704_s16   ;;  %s1272_s15 = sphi %s1326_s15, %s1703_s15  }
   0x8   : > { %p53_p0 = scmp.ne.s32.totalorder %s1276_s16, %s1272_s15  ;;  %p1360_p1 = scmp.eq.s32.totalorder %s912_s21, 0 }
   0x9   : > { %p1364_p2 = scmp.eq.s32.totalorder %s912_s21, 1  ;;  %p163_p3 = scmp.eq.s32.totalorder %s913_s22, 1 }
   0xa   : > { %s1688_s23 = scalar_select %p1360_p1, 1, 0 }
   0xb   : > { %s1689_s24 = scalar_select %p1364_p2, 1, 0 }
   0xc   : > { %p1370_p4 = por %p1360_p1, %p53_p0  ;;  %p914_p5 = scmp.ge.s32.totalorder %s1292_s20, 1 }
   0xd   : > { %p1375_p6 = por %p163_p3, %p53_p0  ;;  %p170_p7 = scmp.lt.s32.totalorder %s1292_s20, 3 }
   0xe   : > { %s1690_s25 = scalar_select %p1370_p4, 1, 0 }
   0xf   : > { %s1691_s26 = scalar_select %p1375_p6, 1, 0 }
  0x10   : > { %p1380_p8 = pnand %p914_p5, %p170_p7  ;;  %s1294_s28 = smov [#allocation5]  }
  0x11   : > { %s184_s29 = sshll.u32 %s1294_s28, 4  ;;  %s33_s5 = sadd.s32 1, %s1288_s19  ;;  %s185_s29 = int_to_ptr.vmem [resolvable:$true] %s184_s29 }
  0x12   : > { %s1692_s27 = scalar_select %p1380_p8, 1, 0 }
  0x13   : > { %p1055_p9 = pneg %p1380_p8  ;;  %s1148_s8 = scalar_lea.hbm %s1680_s1, 1024 }
  0x14   : > { %p1149_p12 = scmp.ne.s32.totalorder %s1680_s1, %s1148_s8  ;;  %p1155_p5 = scmp.lt.u32.totalorder %s1148_s8, %s1680_s1 }
  0x15   : > { %p1389_p11 = pnand %p1055_p9, %p1360_p1 }
  0x17   : > { %p1150_p13 = pneg %p1389_p11 }
  0x19   : > { %p1151_p0 = pnand %p1150_p13, %p1149_p12 }
  0x1b   : > { %p1152_p3 = pneg %p1151_p0 }
  0x1d   : > { %p1157_p7 = pnand %p1155_p5, %p1152_p3 }
  0x1f   : > { %1160 = shalt.err (!%p1157_p7)
}
  0x20   : > { %s1161_s13 = scalar_lea.vmem %s185_s29, 1024  ;;  %p1169_p1 = scmp.lt.s32.totalorder %s185_s29, %s185_s29 }
  0x21   : > { %p1162_p9 = scmp.ne.s32.totalorder %s185_s29, %s1161_s13  ;;  %p1170_p4 = scmp.lt.s32.totalorder %s1161_s13, %s1161_s13 }
  0x23   : > { %p1164_p10 = pnand %p1162_p9, %p1150_p13  ;;  %p1171_p8 = por %p1170_p4, %p1169_p1 }
  0x25   : > { %p1165_p6 = pneg %p1164_p10 }
  0x27   : > { %p1172_p2 = pnand %p1171_p8, %p1165_p6 }
  0x29   : > { %1175 = shalt.err (!%p1172_p2)
}
  0x2a   : > { %s1295_s14 = smov 64   ;;  %s1296_s21 = smov 4  }
  0x2b   : > { %1058 = dma.hbm_to_vmem [thread:$0]  (!%p1389_p11), %s1680_s1, 1024, %s185_s29, [#allocation6], %s1295_s14, %s1295_s14, %s1296_s21  }
  0x2c   : > { %p35_p1 = scmp.ge.s32.totalorder %s33_s5, 2  ;;  %s40_s6 = sadd.s32 1, %s1280_s17 }
  0x2d   : > { %p47_p2 = scmp.ne.s32.totalorder %s1280_s17, %s1276_s16  ;;  %p48_p4 = scmp.eq.s32.totalorder %s1292_s20, 0 }
  0x2e   : > { %s1709_s5 = smov (%p35_p1, %s33_s5), 0  ;;  %p1695_p8 = scmp.ne.s32.totalorder %s1689_s24, 0 }
  0x2f   : > { %p1419_p6 = por %p48_p4, %p47_p2  ;;  %s37_s8 = ssub.s32 %s1288_s19, %s1709_s5 }
  0x30   : > { %p1425_p10 = por %p1695_p8, %p47_p2  ;;  %p1068_p12 = scmp.lt.s32.totalorder %s1292_s20, 2 }
  0x31   : > { %p38_p11 = scmp.eq.s32.totalorder %s37_s8, 0  ;;  %s210_s29 = sand.u32 1, %s1280_s17  }
  0x32   : > { %s919_s9 = sshll.u32 %s210_s29, 7  ;;  %s957_s11 = sshll.u32 %s1288_s19, 11 }
  0x33   : > { %s1434_s10 = scalar_select %p38_p11, %s1280_s17, %s40_s6  }
  0x34   : > { %s1440_s22 = scalar_lea.hbm %s1679_s0, %s957_s11  ;;  %s214_s24 = scalar_lea.vmem [#allocation2], %s919_s9 }
  0x35   : > { %s221_s28 = sshll.u32 %s214_s24, 4  ;;  %p1446_p13 = pnand %p1068_p12, %p1419_p6  ;;  %s1442_s28 = int_to_ptr.vmem [resolvable:$true] %s221_s28 }
  0x36   : > { %s1450_s6 = scalar_lea.sflag [#allocation3], %s210_s29  ;;  %s1176_s12 = scalar_lea.hbm %s1440_s22, 2048 }
  0x37   : > { %p1177_p0 = scmp.ne.s32.totalorder %s1440_s22, %s1176_s12  ;;  %p1178_p3 = pneg %p1446_p13 }
  0x38   : > { %s1181_s7 = scalar_lea.hbm %s1679_s0, 4096  ;;  %p1182_p9 = scmp.lt.u32.totalorder %s1440_s22, %s1679_s0 }
  0x39   : > { %p1179_p5 = pnand %p1178_p3, %p1177_p0  ;;  %p1183_p1 = scmp.lt.u32.totalorder %s1181_s7, %s1176_s12 }
  0x3a   : > { %p1185_p4 = scmp.lt.u32.totalorder %s1176_s12, %s1440_s22 }
  0x3b   : > { %p1180_p7 = pneg %p1179_p5  ;;  %p1184_p2 = por %p1183_p1, %p1182_p9 }
  0x3d   : > { %p1186_p6 = por %p1185_p4, %p1184_p2 }
  0x3f   : > { %p1187_p8 = pnand %p1186_p6, %p1180_p7 }
  0x41   : > { %1190 = shalt.err (!%p1187_p8)
}
  0x42   : > { %s1191_s29 = scalar_lea.vmem %s1442_s28, 2048  ;;  %s1297_s9 = smov [#allocation2]  }
  0x43   : > { %p1192_p12 = scmp.ne.s32.totalorder %s1442_s28, %s1191_s29  ;;  %s1196_s11 = sshll.u32 %s1297_s9, 4  ;;  %s1197_s11 = int_to_ptr.vmem [resolvable:$false] %s1196_s11 }
  0x44   : > { %s1198_s13 = scalar_lea.vmem %s1197_s11, 4096  ;;  %p1199_p5 = scmp.lt.s32.totalorder %s1442_s28, %s1197_s11 }
  0x45   : > { %p1194_p11 = pnand %p1192_p12, %p1178_p3  ;;  %p1200_p9 = scmp.lt.s32.totalorder %s1198_s13, %s1191_s29 }
  0x47   : > { %p1195_p0 = pneg %p1194_p11  ;;  %p1201_p1 = por %p1200_p9, %p1199_p5 }
  0x49   : > { %p1202_p2 = pnand %p1201_p1, %p1195_p0 }
  0x4b   : > { %1205 = shalt.err (!%p1202_p2)
}
  0x4c   : > { %1062 = dma.hbm_to_vmem [thread:$0]  (!%p1446_p13), %s1440_s22, 2048, %s1442_s28, %s1450_s6, %s1295_s14, %s1295_s14, %s1296_s21  }
  0x4d   : > { %p1698_p3 = scmp.ne.s32.totalorder %s1692_s27, 0 }
  0x4e   : > { %s1484_s12 = sand.u32 (!%p1698_p3), 1, %s1276_s16   ;;  %p1699_p7 = scmp.ne.s32.totalorder (!%p1698_p3), %s1690_s25, 0 }
  0x4f   : > { %233 = sbr.rel (%p1698_p3) target bundleno = 383 (0x17f), region = 36  ;;  %s923_s7 = sshll.u32 (!%p1698_p3), %s1484_s12, 7 }
  0x50   : > { %s236_s24 = scalar_lea.sflag (!%p1698_p3), [#allocation3], %s1484_s12  ;;  %s1488_s29 = scalar_lea.vmem (!%p1698_p3), [#allocation2], %s923_s7 }
  0x56   : > { %1259 = dma.done.wait (%p1699_p7), %s236_s24, 2048  }
  0x57   : > { %1261 = vsyncadd (%p1699_p7), %s236_s24, 4294965248  ;;  %p1700_p13 = scmp.ne.s32.totalorder %s1688_s23, 0 }
  0x59   : > { %1263 = dma.done.wait (%p1700_p13), [#allocation6], 1024  }
  0x5a   : > { %1265 = vsyncadd (%p1700_p13), [#allocation6], 4294966272  ;;  %v1124_v0 = vld [vmem:[#allocation5] sm:$0xff]   ;;  %v1125_v1 = vld [vmem:[#allocation5 + $0x8] sm:$0xff]   ;;  %s925_s21 = sshll.u32 %s1484_s12, 8  ;;  %s958_s28 = sshll.u32 %s1284_s18, 12 }
  0x5b   : > { %983 = vmatprep.subr.bf16.mxu0 %v1124_v0  ;;  %1031 = vmatprep.subr.bf16.mxu1 %v1124_v0  ;;  %v1126_v2 = vld [vmem:[#allocation5 + $0x10] sm:$0xff]   ;;  %v1127_v3 = vld [vmem:[#allocation5 + $0x18] sm:$0xff]   ;;  %v1132_v4 = vld [vmem:[%s1488_s29] sm:$0xff]   ;;  %s1541_s22 = scalar_lea.vmem [#allocation7], %s925_s21  ;;  %s1622_s9 = scalar_lea.hbm %s1683_s4, %s958_s28 }
  0x5c   : > { %984 = vmatpush3.bf16.msra.mxu0 %v1124_v0  ;;  %1039 = vmatpush3.bf16.msra.mxu1 %v1124_v0  ;;  %v1133_v5 = vld [vmem:[%s1488_s29 + $0x40] sm:$0xff]   ;;  %v1129_v7 = vld [vmem:[#allocation5 + $0x28] sm:$0xff]   ;;  %v1130_v8 = vld [vmem:[#allocation5 + $0x30] sm:$0xff]   ;;  %s793_s8 = sshll.u32 %s1541_s22, 4  ;;  %s779_s11 = scalar_lea.sflag [#allocation4], %s1484_s12  ;;  %s1624_s8 = int_to_ptr.vmem [resolvable:$true] %s793_s8 }
  0x5d   : > { %985 = vmatprep.subr.bf16.mxu0 %v1125_v1  ;;  %1032 = vmatprep.subr.bf16.mxu1 %v1125_v1  ;;  %v1128_v6 = vld [vmem:[#allocation5 + $0x20] sm:$0xff]   ;;  %v1131_v9 = vld [vmem:[#allocation5 + $0x38] sm:$0xff]   ;;  %v1134_v10 = vld [vmem:[%s1488_s29 + $0x8] sm:$0xff]   ;;  %s1206_s13 = scalar_lea.vmem %s1624_s8, 4096  ;;  %s1298_s7 = smov [#allocation7]  }
  0x5e   : > { %999 = vmatprep.mubr.bf16.mxu0 %v1132_v4  ;;  %1015 = vmatprep.mubr.bf16.mxu1 %v1133_v5  ;;  %v1135_v11 = vld [vmem:[%s1488_s29 + $0x48] sm:$0xff]   ;;  %v1136_v12 = vld [vmem:[%s1488_s29 + $0x10] sm:$0xff]   ;;  %v1138_v14 = vld [vmem:[%s1488_s29 + $0x18] sm:$0xff]   ;;  %p1207_p4 = scmp.ne.s32.totalorder %s1624_s8, %s1206_s13  ;;  %s1210_s24 = sshll.u32 %s1298_s7, 4  ;;  %s1211_s24 = int_to_ptr.vmem [resolvable:$false] %s1210_s24 }
  0x5f   : > { %v1137_v13 = vld [vmem:[%s1488_s29 + $0x50] sm:$0xff]   ;;  %v1139_v15 = vld [vmem:[%s1488_s29 + $0x58] sm:$0xff]   ;;  %v1140_v16 = vld [vmem:[%s1488_s29 + $0x20] sm:$0xff]   ;;  %p1213_p12 = scmp.lt.s32.totalorder %s1624_s8, %s1211_s24 }
  0x60   : > { %986 = vmatpush3.bf16.msra.mxu0 %v1125_v1  ;;  %1040 = vmatpush3.bf16.msra.mxu1 %v1125_v1  ;;  %v1141_v17 = vld [vmem:[%s1488_s29 + $0x60] sm:$0xff]   ;;  %v1142_v18 = vld [vmem:[%s1488_s29 + $0x28] sm:$0xff]   ;;  %v1144_v20 = vld [vmem:[%s1488_s29 + $0x30] sm:$0xff]   ;;  %p1208_p6 = pnand %p1207_p4, %p1425_p10 }
  0x61   : > { %987 = vmatprep.subr.bf16.mxu0 %v1126_v2  ;;  %1033 = vmatprep.subr.bf16.mxu1 %v1126_v2  ;;  %v1143_v19 = vld [vmem:[%s1488_s29 + $0x68] sm:$0xff]   ;;  %v1145_v21 = vld [vmem:[%s1488_s29 + $0x70] sm:$0xff]   ;;  %v1146_v22 = vld [vmem:[%s1488_s29 + $0x38] sm:$0xff]  }
  0x62   : > { %v1147_v23 = vld [vmem:[%s1488_s29 + $0x78] sm:$0xff]   ;;  %v1517_v24 = vld [vmem:[%s1681_s2] ss:$0 sm:$0xff]  ;;  %p1209_p8 = pneg %p1208_p6  ;;  %s1212_s29 = scalar_lea.vmem %s1211_s24, 8192 }
  0x63   : > { %v1522_v26 = vld [vmem:[%s1682_s3] ss:$0 sm:$0xff]  ;;  %p1214_p11 = scmp.lt.s32.totalorder %s1212_s29, %s1206_s13 }
  0x64   : > { %988 = vmatpush3.bf16.msra.mxu0 %v1126_v2  ;;  %1041 = vmatpush3.bf16.msra.mxu1 %v1126_v2 }
  0x65   : > { %989 = vmatprep.subr.bf16.mxu0 %v1127_v3  ;;  %1034 = vmatprep.subr.bf16.mxu1 %v1127_v3  ;;  %p1215_p0 = por %p1214_p11, %p1213_p12 }
  0x67   : > { %p1216_p5 = pnand %p1215_p0, %p1209_p8 }
  0x68   : > { %990 = vmatpush3.bf16.msra.mxu0 %v1127_v3  ;;  %1042 = vmatpush3.bf16.msra.mxu1 %v1127_v3 }
  0x69   : > { %991 = vmatprep.subr.bf16.mxu0 %v1128_v6  ;;  %1035 = vmatprep.subr.bf16.mxu1 %v1128_v6 }
  0x6c   : > { %992 = vmatpush3.bf16.msra.mxu0 %v1128_v6  ;;  %1043 = vmatpush3.bf16.msra.mxu1 %v1128_v6 }
  0x6d   : > { %993 = vmatprep.subr.bf16.mxu0 %v1129_v7  ;;  %1036 = vmatprep.subr.bf16.mxu1 %v1129_v7 }
  0x70   : > { %994 = vmatpush3.bf16.msra.mxu0 %v1129_v7  ;;  %1044 = vmatpush3.bf16.msra.mxu1 %v1129_v7 }
  0x71   : > { %995 = vmatprep.subr.bf16.mxu0 %v1130_v8  ;;  %1037 = vmatprep.subr.bf16.mxu1 %v1130_v8 }
  0x74   : > { %996 = vmatpush3.bf16.msra.mxu0 %v1130_v8  ;;  %1045 = vmatpush3.bf16.msra.mxu1 %v1130_v8 }
  0x75   : > { %997 = vmatprep.subr.bf16.mxu0 %v1131_v9  ;;  %1038 = vmatprep.subr.bf16.mxu1 %v1131_v9 }
  0x78   : > { %998 = vmatpush3.bf16.msra.mxu0 %v1131_v9  ;;  %1046 = vmatpush3.bf16.msra.mxu1 %v1131_v9 }
  0x7b   : > { %1000 = vmatmul.mubr.bf16.vlgmr.msra.gmra.mrb[0].mxu0 %v1134_v10  ;;  %1016 = vmatmul.mubr.bf16.vlgmr.msra.gmra.mrb[0].mxu1 %v1135_v11 }
  0x7c   : > { %1003 = vmatprep.mubr.bf16.mxu0 %v1136_v12  ;;  %1019 = vmatprep.mubr.bf16.mxu1 %v1137_v13 }
  0x83   : > { %1004 = vmatmul.mubr.bf16.gmra.mrb[4].mxu0 %v1138_v14  ;;  %1020 = vmatmul.mubr.bf16.gmra.mrb[4].mxu1 %v1139_v15 }
  0x84   : > { %1007 = vmatprep.mubr.bf16.mxu0 %v1140_v16  ;;  %1023 = vmatprep.mubr.bf16.mxu1 %v1141_v17 }
  0x8b   : > { %1008 = vmatmul.mubr.bf16.gmra.mrb[8].mxu0 %v1142_v18  ;;  %1024 = vmatmul.mubr.bf16.gmra.mrb[8].mxu1 %v1143_v19 }
  0x8c   : > { %1011 = vmatprep.mubr.bf16.mxu0 %v1144_v20  ;;  %1027 = vmatprep.mubr.bf16.mxu1 %v1145_v21 }
  0x93   : > { %1012 = vmatmul.mubr.bf16.gmra.mrb[12].mxu0 %v1146_v22  ;;  %1028 = vmatmul.mubr.bf16.gmra.mrb[12].mxu1 %v1147_v23 }
 0x14e   : > { %v1001_v25 = vpop.f32.mrb[0].mxu0  ;;  %v1017_v27 = vpop.f32.mrb[0].mxu1 }
 0x14f   : > { %v645_v28 = vmul.f32 %v1001_v25, %v1517_v24  ;;  %v661_v29 = vmul.f32 %v1017_v27, %v1517_v24  ;;  %v509_v30 = vpop.f32.mrb[1].mxu0  ;;  %v573_v31 = vpop.f32.mrb[1].mxu1 }
 0x150   : > { %v643_v32 = vmul.f32 %v1517_v24, %v509_v30  ;;  %v659_v33 = vmul.f32 %v1517_v24, %v573_v31  ;;  %v1002_v34 = vpop.f32.mrb[2].mxu0  ;;  %v1018_v35 = vpop.f32.mrb[2].mxu1 }
 0x151   : > { %v684_v36 = vadd.f32 %v1522_v26, %v645_v28  ;;  %v700_v37 = vadd.f32 %v1522_v26, %v661_v29  ;;  %v646_v38 = vmul.f32 %v1002_v34, %v1517_v24  ;;  %v662_v39 = vmul.f32 %v1018_v35, %v1517_v24  ;;  %v512_v40 = vpop.f32.mrb[3].mxu0  ;;  %v576_v41 = vpop.f32.mrb[3].mxu1 }
 0x152   : > { %v682_v42 = vadd.f32 %v1522_v26, %v643_v32  ;;  %v698_v43 = vadd.f32 %v1522_v26, %v659_v33  ;;  %v644_v44 = vmul.f32 %v1517_v24, %v512_v40  ;;  %v660_v45 = vmul.f32 %v1517_v24, %v576_v41 }
 0x153   : > { %v716_v46 = vmax.f32 %v684_v36, 0.0  ;;  %v732_v47 = vmax.f32 %v700_v37, 0.0  ;;  %v685_v48 = vadd.f32 %v1522_v26, %v646_v38  ;;  %v701_v49 = vadd.f32 %v1522_v26, %v662_v39 }
 0x154   : > { %v714_v50 = vmax.f32 %v682_v42, 0.0  ;;  %v730_v51 = vmax.f32 %v698_v43, 0.0  ;;  %v683_v52 = vadd.f32 %v1522_v26, %v644_v44  ;;  %v699_v53 = vadd.f32 %v1522_v26, %v660_v45 }
 0x155   : > { %748 = vst [vmem:[%s1541_s22 + $0x10] sm:$0xff] %v716_v46  ;;  %764 = vst [vmem:[%s1541_s22 + $0x90] sm:$0xff] %v732_v47  ;;  %v717_v54 = vmax.f32 %v685_v48, 0.0  ;;  %v733_v55 = vmax.f32 %v701_v49, 0.0 }
 0x156   : > { %746 = vst [vmem:[%s1541_s22] sm:$0xff] %v714_v50  ;;  %762 = vst [vmem:[%s1541_s22 + $0x80] sm:$0xff] %v730_v51  ;;  %v715_v56 = vmax.f32 %v683_v52, 0.0  ;;  %v731_v57 = vmax.f32 %v699_v53, 0.0  ;;  %v1005_v58 = vpop.f32.mrb[4].mxu0  ;;  %v1021_v59 = vpop.f32.mrb[4].mxu1 }
 0x157   : > { %749 = vst [vmem:[%s1541_s22 + $0x18] sm:$0xff] %v717_v54  ;;  %765 = vst [vmem:[%s1541_s22 + $0x98] sm:$0xff] %v733_v55  ;;  %v649_v60 = vmul.f32 %v1005_v58, %v1517_v24  ;;  %v665_v61 = vmul.f32 %v1021_v59, %v1517_v24  ;;  %v525_v62 = vpop.f32.mrb[5].mxu0  ;;  %v589_v63 = vpop.f32.mrb[5].mxu1 }
 0x158   : > { %747 = vst [vmem:[%s1541_s22 + $0x8] sm:$0xff] %v715_v56  ;;  %763 = vst [vmem:[%s1541_s22 + $0x88] sm:$0xff] %v731_v57  ;;  %v647_v0 = vmul.f32 %v1517_v24, %v525_v62  ;;  %v663_v1 = vmul.f32 %v1517_v24, %v589_v63  ;;  %v1006_v2 = vpop.f32.mrb[6].mxu0  ;;  %v1022_v3 = vpop.f32.mrb[6].mxu1 }
 0x159   : > { %v688_v4 = vadd.f32 %v1522_v26, %v649_v60  ;;  %v704_v5 = vadd.f32 %v1522_v26, %v665_v61  ;;  %v650_v6 = vmul.f32 %v1006_v2, %v1517_v24  ;;  %v666_v7 = vmul.f32 %v1022_v3, %v1517_v24  ;;  %v528_v8 = vpop.f32.mrb[7].mxu0  ;;  %v592_v9 = vpop.f32.mrb[7].mxu1 }
 0x15a   : > { %v686_v10 = vadd.f32 %v1522_v26, %v647_v0  ;;  %v702_v11 = vadd.f32 %v1522_v26, %v663_v1  ;;  %v648_v12 = vmul.f32 %v1517_v24, %v528_v8  ;;  %v664_v13 = vmul.f32 %v1517_v24, %v592_v9 }
 0x15b   : > { %v720_v14 = vmax.f32 %v688_v4, 0.0  ;;  %v736_v15 = vmax.f32 %v704_v5, 0.0  ;;  %v689_v16 = vadd.f32 %v1522_v26, %v650_v6  ;;  %v705_v17 = vadd.f32 %v1522_v26, %v666_v7 }
 0x15c   : > { %v718_v18 = vmax.f32 %v686_v10, 0.0  ;;  %v734_v19 = vmax.f32 %v702_v11, 0.0  ;;  %v687_v20 = vadd.f32 %v1522_v26, %v648_v12  ;;  %v703_v21 = vadd.f32 %v1522_v26, %v664_v13 }
 0x15d   : > { %752 = vst [vmem:[%s1541_s22 + $0x30] sm:$0xff] %v720_v14  ;;  %768 = vst [vmem:[%s1541_s22 + $0xb0] sm:$0xff] %v736_v15  ;;  %v721_v22 = vmax.f32 %v689_v16, 0.0  ;;  %v737_v23 = vmax.f32 %v705_v17, 0.0 }
 0x15e   : > { %750 = vst [vmem:[%s1541_s22 + $0x20] sm:$0xff] %v718_v18  ;;  %766 = vst [vmem:[%s1541_s22 + $0xa0] sm:$0xff] %v734_v19  ;;  %v719_v25 = vmax.f32 %v687_v20, 0.0  ;;  %v735_v27 = vmax.f32 %v703_v21, 0.0  ;;  %v1009_v28 = vpop.f32.mrb[8].mxu0  ;;  %v1025_v29 = vpop.f32.mrb[8].mxu1 }
 0x15f   : > { %753 = vst [vmem:[%s1541_s22 + $0x38] sm:$0xff] %v721_v22  ;;  %769 = vst [vmem:[%s1541_s22 + $0xb8] sm:$0xff] %v737_v23  ;;  %v653_v30 = vmul.f32 %v1009_v28, %v1517_v24  ;;  %v669_v31 = vmul.f32 %v1025_v29, %v1517_v24  ;;  %v541_v32 = vpop.f32.mrb[9].mxu0  ;;  %v605_v33 = vpop.f32.mrb[9].mxu1 }
 0x160   : > { %751 = vst [vmem:[%s1541_s22 + $0x28] sm:$0xff] %v719_v25  ;;  %767 = vst [vmem:[%s1541_s22 + $0xa8] sm:$0xff] %v735_v27  ;;  %v651_v34 = vmul.f32 %v1517_v24, %v541_v32  ;;  %v667_v35 = vmul.f32 %v1517_v24, %v605_v33  ;;  %v1010_v36 = vpop.f32.mrb[10].mxu0  ;;  %v1026_v37 = vpop.f32.mrb[10].mxu1 }
 0x161   : > { %v692_v38 = vadd.f32 %v1522_v26, %v653_v30  ;;  %v708_v39 = vadd.f32 %v1522_v26, %v669_v31  ;;  %v654_v40 = vmul.f32 %v1010_v36, %v1517_v24  ;;  %v670_v41 = vmul.f32 %v1026_v37, %v1517_v24  ;;  %v544_v42 = vpop.f32.mrb[11].mxu0  ;;  %v608_v43 = vpop.f32.mrb[11].mxu1 }
 0x162   : > { %v690_v44 = vadd.f32 %v1522_v26, %v651_v34  ;;  %v706_v45 = vadd.f32 %v1522_v26, %v667_v35  ;;  %v652_v46 = vmul.f32 %v1517_v24, %v544_v42  ;;  %v668_v47 = vmul.f32 %v1517_v24, %v608_v43 }
 0x163   : > { %v724_v48 = vmax.f32 %v692_v38, 0.0  ;;  %v740_v49 = vmax.f32 %v708_v39, 0.0  ;;  %v693_v50 = vadd.f32 %v1522_v26, %v654_v40  ;;  %v709_v51 = vadd.f32 %v1522_v26, %v670_v41 }
 0x164   : > { %v722_v52 = vmax.f32 %v690_v44, 0.0  ;;  %v738_v53 = vmax.f32 %v706_v45, 0.0  ;;  %v691_v54 = vadd.f32 %v1522_v26, %v652_v46  ;;  %v707_v55 = vadd.f32 %v1522_v26, %v668_v47 }
 0x165   : > { %756 = vst [vmem:[%s1541_s22 + $0x50] sm:$0xff] %v724_v48  ;;  %772 = vst [vmem:[%s1541_s22 + $0xd0] sm:$0xff] %v740_v49  ;;  %v725_v56 = vmax.f32 %v693_v50, 0.0  ;;  %v741_v57 = vmax.f32 %v709_v51, 0.0 }
 0x166   : > { %754 = vst [vmem:[%s1541_s22 + $0x40] sm:$0xff] %v722_v52  ;;  %770 = vst [vmem:[%s1541_s22 + $0xc0] sm:$0xff] %v738_v53  ;;  %v723_v58 = vmax.f32 %v691_v54, 0.0  ;;  %v739_v59 = vmax.f32 %v707_v55, 0.0  ;;  %v1013_v60 = vpop.f32.mrb[12].mxu0  ;;  %v1029_v61 = vpop.f32.mrb[12].mxu1 }
 0x167   : > { %757 = vst [vmem:[%s1541_s22 + $0x58] sm:$0xff] %v725_v56  ;;  %773 = vst [vmem:[%s1541_s22 + $0xd8] sm:$0xff] %v741_v57  ;;  %v657_v62 = vmul.f32 %v1013_v60, %v1517_v24  ;;  %v673_v63 = vmul.f32 %v1029_v61, %v1517_v24  ;;  %v557_v0 = vpop.f32.mrb[13].mxu0  ;;  %v621_v1 = vpop.f32.mrb[13].mxu1 }
 0x168   : > { %755 = vst [vmem:[%s1541_s22 + $0x48] sm:$0xff] %v723_v58  ;;  %771 = vst [vmem:[%s1541_s22 + $0xc8] sm:$0xff] %v739_v59  ;;  %v655_v2 = vmul.f32 %v1517_v24, %v557_v0  ;;  %v671_v3 = vmul.f32 %v1517_v24, %v621_v1  ;;  %v1014_v4 = vpop.f32.mrb[14].mxu0  ;;  %v1030_v5 = vpop.f32.mrb[14].mxu1 }
 0x169   : > { %v696_v6 = vadd.f32 %v1522_v26, %v657_v62  ;;  %v712_v7 = vadd.f32 %v1522_v26, %v673_v63  ;;  %v658_v8 = vmul.f32 %v1014_v4, %v1517_v24  ;;  %v674_v9 = vmul.f32 %v1030_v5, %v1517_v24  ;;  %v560_v10 = vpop.f32.mrb[15].mxu0  ;;  %v624_v11 = vpop.f32.mrb[15].mxu1 }
 0x16a   : > { %v694_v12 = vadd.f32 %v1522_v26, %v655_v2  ;;  %v710_v13 = vadd.f32 %v1522_v26, %v671_v3  ;;  %v656_v14 = vmul.f32 %v1517_v24, %v560_v10  ;;  %v672_v15 = vmul.f32 %v1517_v24, %v624_v11 }
 0x16b   : > { %v728_v16 = vmax.f32 %v696_v6, 0.0  ;;  %v744_v17 = vmax.f32 %v712_v7, 0.0  ;;  %v697_v18 = vadd.f32 %v1522_v26, %v658_v8  ;;  %v713_v19 = vadd.f32 %v1522_v26, %v674_v9 }
 0x16c   : > { %v726_v20 = vmax.f32 %v694_v12, 0.0  ;;  %v742_v21 = vmax.f32 %v710_v13, 0.0  ;;  %v695_v22 = vadd.f32 %v1522_v26, %v656_v14  ;;  %v711_v24 = vadd.f32 %v1522_v26, %v672_v15 }
 0x16d   : > { %760 = vst [vmem:[%s1541_s22 + $0x70] sm:$0xff] %v728_v16  ;;  %776 = vst [vmem:[%s1541_s22 + $0xf0] sm:$0xff] %v744_v17  ;;  %v729_v23 = vmax.f32 %v697_v18, 0.0  ;;  %v745_v25 = vmax.f32 %v713_v19, 0.0 }
 0x16e   : > { %758 = vst [vmem:[%s1541_s22 + $0x60] sm:$0xff] %v726_v20  ;;  %774 = vst [vmem:[%s1541_s22 + $0xe0] sm:$0xff] %v742_v21  ;;  %v727_v27 = vmax.f32 %v695_v22, 0.0  ;;  %v743_v28 = vmax.f32 %v711_v24, 0.0 }
 0x16f   : > { %761 = vst [vmem:[%s1541_s22 + $0x78] sm:$0xff] %v729_v23  ;;  %777 = vst [vmem:[%s1541_s22 + $0xf8] sm:$0xff] %v745_v25 }
 0x170   : > { %759 = vst [vmem:[%s1541_s22 + $0x68] sm:$0xff] %v727_v27  ;;  %775 = vst [vmem:[%s1541_s22 + $0xe8] sm:$0xff] %v743_v28 }
 0x171   : > { %1219 = shalt.err (!%p1216_p5)
}
 0x172   : > { %s1220_s23 = scalar_lea.hbm %s1622_s9, 4096  ;;  %s1224_s14 = scalar_lea.hbm %s1683_s4, 8192 }
 0x173   : > { %p1221_p9 = scmp.ne.s32.totalorder %s1622_s9, %s1220_s23  ;;  %p1225_p3 = scmp.lt.u32.totalorder %s1622_s9, %s1683_s4 }
 0x174   : > { %p1226_p7 = scmp.lt.u32.totalorder %s1224_s14, %s1220_s23  ;;  %p1228_p4 = scmp.lt.u32.totalorder %s1220_s23, %s1622_s9 }
 0x175   : > { %p1222_p1 = pnand %p1221_p9, %p1425_p10 }
 0x176   : > { %p1227_p13 = por %p1226_p7, %p1225_p3 }
 0x177   : > { %p1223_p2 = pneg %p1222_p1 }
 0x178   : > { %p1229_p6 = por %p1228_p4, %p1227_p13 }
 0x17a   : > { %p1230_p8 = pnand %p1229_p6, %p1223_p2 }
 0x17c   : > { %1233 = shalt.err (!%p1230_p8)
}
 0x17d   : > { %s1299_s28 = smov 128   ;;  %s1300_s18 = smov 8  }
 0x17e   : > { %1053 = dma.vmem_to_hbm [thread:$0]  (%p1425_p10), %s1624_s8, 4096, %s1622_s9, %s779_s11, %s1299_s28, %s1299_s28, %s1300_s18  }
 0x17f PF: > { %s808_s6 = sand.u32 1, %s1272_s15   ;;  %p1701_p12 = scmp.ne.s32.totalorder %s1691_s26, 0 }
 0x180   : > { %p1702_p11 = scmp.ge.s32.totalorder %s1292_s20, 2  ;;  %s809_s13 = scalar_lea.sflag [#allocation4], %s808_s6 }
 0x182   : > { %p1064_p0 = pnand %p1702_p11, %p1701_p12 }
 0x184   : > { %1267 = dma.done.wait (!%p1064_p0), %s809_s13, 4096  }
 0x185   : > { %1269 = vsyncadd (!%p1064_p0), %s809_s13, 4294963200  ;;  %s21_s20 = sadd.s32 1, %s1292_s20   ;;  %s1703_s15 = smov %s1276_s16 }
 0x186   : > { %p18_p5 = scmp.ge.s32.totalorder %s21_s20, 4   ;;  %s1704_s16 = smov %s1280_s17 }
 0x187   : > { %s1705_s17 = smov %s1434_s10  ;;  %s1706_s18 = smov %s1288_s19 }
 0x188   : > { %s1707_s19 = smov %s1709_s5  ;;  %20 = sbr.rel (!%p18_p5) target bundleno = 7 (0x7), region = 92 }
 0x18f   :  { %814 = vsyncpa [#allocation3], 1 }
 0x190   :  { %816 = vsyncpa [#allocation3 + $0x1], 1 }
 0x191   :  { %817 = vsyncpa [#allocation6], 1 }
 0x192   :  { %818 = vsyncpa [#allocation4], 1 }
 0x193   :  { %820 = vsyncpa [#allocation4 + $0x1], 1 }

</bundles_post_ra>
